<compile_context>
chip_gen: v5e
topology: v5e:2x2
jax: 0.10.0
libtpu: 0.0.40
codegen_flags: <defaults>
</compile_context>

<pallas_src>
import jax
import jax.numpy as jnp
from jax.experimental import pallas as pl
from jax.experimental.pallas import tpu as pltpu


def mlp_kernel(x_ref, w1_ref, b1_ref, w2_ref, b2_ref, o_ref):
    # x_ref : (1, Np)          VMEM
    # w1_ref: (n_hidden, 1)    VMEM
    # b1_ref: (n_hidden, 1)    VMEM
    # w2_ref: (n_hidden, 1)    VMEM
    # b2_ref: (1, 1)           SMEM (scalar)
    # o_ref : (1, Np)          VMEM
    #
    # Layer 1 (K = 1 contraction == outer product): pure VPU broadcast mul/add + relu.
    h = jnp.maximum(w1_ref[...] * x_ref[...] + b1_ref[...], 0.0)   # (n_hidden, Np)
    # Layer 2 (N = 1 output): elementwise mul + 32-wide sublane reduction (XLU slot).
    out = jnp.sum(h * w2_ref[...], axis=0, keepdims=True)          # (1, Np)
    o_ref[...] = out + b2_ref[0, 0]


def net_forward(x, w1, b1, w2, b2, n_pad=128):
    """x: (N, n_feature=1), w1: (1, n_hidden), b1: (1, n_hidden),
    w2: (n_hidden, 1), b2: (1, 1).  Returns (N, 1)."""
    n = x.shape[0]
    n_hidden = w1.shape[1]
    n_output = w2.shape[1]
    assert x.shape[1] == 1 and n_output == 1, "kernel is specialized to n_feature=1, n_output=1"

    # Wrapper-side layout plumbing: lane-dense, padded batch; column-shaped params.
    x_t = jnp.zeros((1, n_pad), jnp.float32).at[0, :n].set(x[:, 0])
    w1_col = w1.reshape(n_hidden, 1)
    b1_col = b1.reshape(n_hidden, 1)
    w2_col = w2.reshape(n_hidden, 1)
    b2_s = b2.reshape(1, 1)

    vmem = pl.BlockSpec(memory_space=pltpu.MemorySpace.VMEM)
    smem = pl.BlockSpec(memory_space=pltpu.MemorySpace.SMEM)

    # Single grid point: whole problem is < 2 KB, launch-overhead bound; no tiling,
    # no megacore sharding, no pipelining.
    # TODO(synk): if this MLP is part of a larger workload, fuse it into the
    # surrounding kernel (or plain XLA) rather than paying a standalone custom call.
    out_t = pl.pallas_call(
        mlp_kernel,
        out_shape=jax.ShapeDtypeStruct((1, n_pad), jnp.float32),
        in_specs=[vmem, vmem, vmem, vmem, smem],
        out_specs=vmem,
    )(x_t, w1_col, b1_col, w2_col, b2_s)

    # Slice off padded lanes and restore the (N, 1) PyTorch layout.
    return out_t[0, :n].reshape(n, n_output)


def init_linear_params(key, fan_in, fan_out):
    # Deterministic init mimicking torch.nn.Linear's default:
    # U(-1/sqrt(fan_in), 1/sqrt(fan_in)) for both weight and bias.
    kw, kb = jax.random.split(key)
    bound = 1.0 / jnp.sqrt(jnp.float32(fan_in))
    w = jax.random.uniform(kw, (fan_in, fan_out), jnp.float32, -bound, bound)
    b = jax.random.uniform(kb, (1, fan_out), jnp.float32, -bound, bound)
    return w, b


if __name__ == "__main__":
    # Shapes implied by the module's usage: x = linspace(-1, 1, 100).unsqueeze(1)
    N, n_feature, n_hidden, n_output = 100, 1, 32, 1

    key = jax.random.PRNGKey(0)
    k1, k2 = jax.random.split(key)
    w1, b1 = init_linear_params(k1, n_feature, n_hidden)
    w2, b2 = init_linear_params(k2, n_hidden, n_output)

    # Same input the original script builds.
    x = jnp.linspace(-1.0, 1.0, N, dtype=jnp.float32).reshape(N, 1)

    out = net_forward(x, w1, b1, w2, b2)
    out = jax.block_until_ready(out)

    # Pure-JAX reference check of the forward semantics.
    ref = jnp.maximum(x @ w1 + b1, 0.0) @ w2 + b2
    assert out.shape == (N, n_output)
    assert jnp.allclose(out, ref, atol=1e-5, rtol=1e-5)

    print("KERNEL_OK")
</pallas_src>

<mosaic_0001>
module attributes {stable_mosaic.version = 11 : i64} {
  func.func @mlp_kernel(%arg0: memref<1x128xf32, #tpu.memory_space<vmem>>, %arg1: memref<32x1xf32, #tpu.memory_space<vmem>>, %arg2: memref<32x1xf32, #tpu.memory_space<vmem>>, %arg3: memref<32x1xf32, #tpu.memory_space<vmem>>, %arg4: memref<1x1xf32, #tpu.memory_space<smem>>, %arg5: memref<1x128xf32, #tpu.memory_space<vmem>>) attributes {dimension_semantics = [], scalar_prefetch = 0 : i64, scratch_operands = 0 : i64, tpu.core_type = #tpu.core_type<tc>} {
    %c0 = arith.constant 0 : index
    %c0_0 = arith.constant 0 : index
    %0 = vector.load %arg1[%c0, %c0_0] : memref<32x1xf32, #tpu.memory_space<vmem>>, vector<32x1xf32>
    %c0_1 = arith.constant 0 : index
    %c0_2 = arith.constant 0 : index
    %1 = vector.load %arg0[%c0_1, %c0_2] : memref<1x128xf32, #tpu.memory_space<vmem>>, vector<1x128xf32>
    %2 = vector.broadcast %0 : vector<32x1xf32> to vector<32x128xf32>
    %3 = vector.broadcast %1 : vector<1x128xf32> to vector<32x128xf32>
    %4 = arith.mulf %2, %3 : vector<32x128xf32>
    %c0_3 = arith.constant 0 : index
    %c0_4 = arith.constant 0 : index
    %5 = vector.load %arg2[%c0_3, %c0_4] : memref<32x1xf32, #tpu.memory_space<vmem>>, vector<32x1xf32>
    %6 = vector.broadcast %5 : vector<32x1xf32> to vector<32x128xf32>
    %7 = arith.addf %4, %6 : vector<32x128xf32>
    %cst = arith.constant 0.000000e+00 : f32
    %8 = vector.broadcast %cst : f32 to vector<32x128xf32>
    %9 = arith.maximumf %7, %8 : vector<32x128xf32>
    %c0_5 = arith.constant 0 : index
    %c0_6 = arith.constant 0 : index
    %10 = vector.load %arg3[%c0_5, %c0_6] : memref<32x1xf32, #tpu.memory_space<vmem>>, vector<32x1xf32>
    %11 = vector.broadcast %10 : vector<32x1xf32> to vector<32x128xf32>
    %12 = arith.mulf %9, %11 : vector<32x128xf32>
    %cst_7 = arith.constant dense<0.000000e+00> : vector<128xf32>
    %13 = vector.multi_reduction <add>, %12, %cst_7 [0] : vector<32x128xf32> to vector<128xf32>
    %14 = vector.shape_cast %13 : vector<128xf32> to vector<1x128xf32>
    %c0_8 = arith.constant 0 : index
    %c0_9 = arith.constant 0 : index
    %15 = memref.load %arg4[%c0_8, %c0_9] : memref<1x1xf32, #tpu.memory_space<smem>>
    %16 = vector.broadcast %15 : f32 to vector<1x128xf32>
    %17 = arith.addf %14, %16 : vector<1x128xf32>
    %c0_10 = arith.constant 0 : index
    %c0_11 = arith.constant 0 : index
    %18 = vector.load %arg5[%c0_10, %c0_11] : memref<1x128xf32, #tpu.memory_space<vmem>>, vector<1x128xf32>
    tpu.vector_store %arg5[%c0_10, %c0_11], %17 {strides = array<i32>} : memref<1x128xf32, #tpu.memory_space<vmem>>, vector<1x128xf32>,
    return
  }
}

</mosaic_0001>

<bundles_post_ra>
// kernel: tpu_custom_call.1
= control target key start
LH: loop header
LB: loop body
LE: loop exit
PB: predicated region body
PF: predicated region fallthrough
CT: control target
= control target key end

     0   :  { %v175_v2 = vmov 0   ;;  %s252_s0 = inlined_call_operand.vmem [shape: f32[1,128], index: 0, kind: input, shape index: {}]   ;;  %s253_s1 = inlined_call_operand.vmem [shape: f32[32,1], index: 1, kind: input, shape index: {}]   ;;  %s254_s2 = inlined_call_operand.vmem [shape: f32[32,1], index: 2, kind: input, shape index: {}]   ;;  %s255_s3 = inlined_call_operand.vmem [shape: f32[32,1], index: 3, kind: input, shape index: {}]   ;;  %s256_s4 = inlined_call_operand.<no memory space> [shape: f32[1,1], index: 4, kind: input, shape index: {}]   ;;  %s257_s5 = inlined_call_operand.hbm [shape: f32[1,128], index: 5, kind: output, shape index: {}]  }
   0x1   :  { %v24_v0 = vld [vmem:[%s253_s1 + $0x10] sm:$0xff]  ;;  %v22_v1 = vld [vmem:[%s253_s1] sm:$0xff]  ;;  %146 = vset.pattern.permute.xlu1 %v175_v2  ;;  %145 = vset.pattern.permute.xlu0 %v175_v2  ;;  %v55_v3 = vld [vmem:[%s254_s2 + $0x8] sm:$0xff] }
   0x2   :  { %39 = vperm.xlu1 %146, %v24_v0   ;;  %29 = vperm.xlu0 %145, %v22_v1  }
   0x3   :  { %147 = vset.pattern.permute.xlu2 %v175_v2 }
   0x4   :  { %65 = vperm.xlu2 %147, %v55_v3  }
   0x5   :  { %11 = vsyncpa [#allocation4], 0  ;;  %v54_v4 = vld [vmem:[%s254_s2] sm:$0xff]  ;;  %v23_v5 = vld [vmem:[%s253_s1 + $0x8] sm:$0xff]  ;;  %v124_v50 = vstv %s256_s4  ;;  %s176_s17 = smov [#allocation3]   ;;  %s134_s21 = sshll.u32 %s257_s5, 4  ;;  %s135_s21 = int_to_ptr.hbm [resolvable:$true] %s134_s21 }
   0x6   :  { %v25_v6 = vld [vmem:[%s253_s1 + $0x18] sm:$0xff]  ;;  %v56_v8 = vld [vmem:[%s254_s2 + $0x10] sm:$0xff]  ;;  %v86_v9 = vld [vmem:[%s255_s3] sm:$0xff]  ;;  %s132_s18 = sshll.u32 %s176_s17, 4  ;;  %s133_s18 = int_to_ptr.vmem [resolvable:$true] %s132_s18 }
   0x7   :  { %v57_v7 = vld [vmem:[%s254_s2 + $0x18] sm:$0xff]  ;;  %v88_v10 = vld [vmem:[%s255_s3 + $0x10] sm:$0xff]  ;;  %v87_v11 = vld [vmem:[%s255_s3 + $0x8] sm:$0xff] }
   0x8   :  { %v89_v12 = vld [vmem:[%s255_s3 + $0x18] sm:$0xff]  ;;  %v148_v19 = vld [vmem:[%s252_s0] ss:$0 sm:$0xff] }
   0xa   :  { %60 = vperm.xlu1 %146, %v54_v4   ;;  %34 = vperm.xlu0 %145, %v23_v5  }
   0xc   :  { %44 = vperm.xlu2 %147, %v25_v6  }
  0x12   :  { %75 = vperm.xlu1 %146, %v57_v7   ;;  %70 = vperm.xlu0 %145, %v56_v8  }
  0x14   :  { %92 = vperm.xlu2 %147, %v86_v9  }
  0x1a   :  { %102 = vperm.xlu1 %146, %v88_v10   ;;  %97 = vperm.xlu0 %145, %v87_v11  }
  0x1c   :  { %107 = vperm.xlu2 %147, %v89_v12  }
  0x5e   :  { %v66_v13 = vpop.permute.xlu2 %65 }
  0x66   :  { %v45_v16 = vpop.permute.xlu2 %44 }
  0x67   :  { %v53_v26 = vmul.f32 %v148_v19, %v45_v16 }
  0x6e   :  { %v93_v25 = vpop.permute.xlu2 %92 }
  0x74   :  { %v40_v14 = vpop.permute.xlu1 %39  ;;  %v30_v15 = vpop.permute.xlu0 %29 }
  0x75   :  { %v50_v20 = vmul.f32 %v148_v19, %v30_v15  ;;  %v52_v27 = vmul.f32 %v148_v19, %v40_v14 }
  0x76   :  { %v108_v41 = vpop.permute.xlu2 %107 }
  0x7c   :  { %v61_v17 = vpop.permute.xlu1 %60  ;;  %v35_v18 = vpop.permute.xlu0 %34 }
  0x7d   :  { %v51_v21 = vmul.f32 %v148_v19, %v35_v18  ;;  %v78_v24 = vadd.f32 %v61_v17, %v50_v20 }
  0x7f   :  { %v79_v28 = vadd.f32 %v66_v13, %v51_v21  ;;  %v82_v29 = vmax.f32 %v78_v24, 0.0 }
  0x81   :  { %v83_v32 = vmax.f32 %v79_v28, 0.0  ;;  %v110_v35 = vmul.f32 %v93_v25, %v82_v29 }
  0x84   :  { %v76_v22 = vpop.permute.xlu1 %75  ;;  %v71_v23 = vpop.permute.xlu0 %70 }
  0x85   :  { %v81_v30 = vadd.f32 %v76_v22, %v53_v26  ;;  %v80_v31 = vadd.f32 %v71_v23, %v52_v27 }
  0x87   :  { %v85_v36 = vmax.f32 %v81_v30, 0.0  ;;  %v84_v37 = vmax.f32 %v80_v31, 0.0 }
  0x89   :  { %v113_v42 = vmul.f32 %v108_v41, %v85_v36 }
  0x8c   :  { %v103_v33 = vpop.permute.xlu1 %102  ;;  %v98_v34 = vpop.permute.xlu0 %97 }
  0x8d   :  { %v111_v38 = vmul.f32 %v98_v34, %v83_v32  ;;  %v112_v39 = vmul.f32 %v103_v33, %v84_v37 }
  0x8f   :  { %v114_v40 = vadd.f32 %v111_v38, %v110_v35 }
  0x91   :  { %v115_v43 = vadd.f32 %v114_v40, %v112_v39 }
  0x93   :  { %v116_v44 = vadd.f32 %v115_v43, %v113_v42 }
  0x95   :  { %v117_v45 = vrot.slane %v116_v44, 4 }
  0x97   :  { %v118_v46 = vadd.f32 %v117_v45, %v116_v44 }
  0x99   :  { %v119_v47 = vrot.slane %v118_v46, 2 }
  0x9b   :  { %v120_v48 = vadd.f32 %v119_v47, %v118_v46 }
  0x9d   :  { %v121_v49 = vrot.slane %v120_v48, 1 }
  0x9f   :  { %v122_v51 = vadd.f32 %v121_v49, %v120_v48 }
  0xa1   :  { %v125_v52 = vadd.f32 %v124_v50, %v122_v51 }
  0xa3   :  { %126 = vst [vmem:[#allocation3] sm:$0x1] %v125_v52 }
  0xa4   :  { %137 = dma.vmem_to_hbm [thread:$0]  %s133_s18, 16, %s135_s21, [#allocation4]  }
  0xa5   :  { %173 = dma.done.wait [#allocation4], 16  }
  0xa6   :  { %174 = vsyncadd [#allocation4], 4294967280 }
  0xa7   :  { %142 = vsyncpa [#allocation4], 1 }

</bundles_post_ra>
